<compile_context>
chip_gen: v6e
topology: v6e:2x2x1
jax: 0.10.0
libtpu: 0.0.40
codegen_flags: <defaults>
</compile_context>

<pallas_src>
import functools
import math

import jax
import jax.numpy as jnp
from jax import lax
from jax.experimental import pallas as pl
from jax.experimental.pallas import tpu as pltpu

# Non-center taps of the 3x3 kernel (tap 4 is the center and needs no mask).
_TAPS = (0, 1, 2, 3, 5, 6, 7, 8)


def _sepconv_kernel(x_ref, mask_ref, wdw_ref, wbig_ref, o_ref, *, H, W):
    # x_ref:    (R_in,  H*W)   B_TILE samples x C channels, spatially flattened
    # mask_ref: (8,     H*W)   {0,1} f32 border masks, one row per non-center tap
    # wdw_ref:  (R_in,  9)     depthwise 3x3 weights, tiled per sample row
    # wbig_ref: (R_out, R_in)  block-diagonal pointwise weights (w_pw per sample)
    # o_ref:    (R_out, H*W)   output slab (lane-dense)
    eps = 1e-5
    alpha = 0.2
    HW = H * W
    inv_hw = 1.0 / HW

    x = x_ref[...].astype(jnp.float32)        # (R_in, HW)
    wdw = wdw_ref[...].astype(jnp.float32)    # (R_in, 9)
    masks = mask_ref[...]                     # (8, HW) f32 {0,1}

    # ---- depthwise 3x3 conv, padding=1 (zero border), all rows at once ------
    # Tap k -> spatial offset (dy, dx) = (k // 3 - 1, k % 3 - 1).
    # shifted[p] = x[p + dy*W + dx] is a lane rotation (XLU slot) of each
    # flattened plane; wrapped-around lanes are zeroed by the precomputed mask.
    # Valid ONLY for kernel 3x3 / stride 1 / pad 1 (asserted in the wrapper).
    acc = wdw[:, 4:5] * x                     # center tap initializes acc
    for j, k in enumerate(_TAPS):
        dy = k // 3 - 1
        dx = k % 3 - 1
        d = dy * W + dx
        shifted = pltpu.roll(x, shift=(-d) % HW, axis=1)    # shifted[p]=x[p+d]
        acc = acc + wdw[:, k:k + 1] * (shifted * masks[j:j + 1, :])

    # ---- InstanceNorm2d (no affine, biased var, two-pass) + LeakyReLU(0.2) --
    def inorm_lrelu(t):
        mu = jnp.sum(t, axis=1, keepdims=True) * inv_hw
        d = t - mu
        var = jnp.sum(d * d, axis=1, keepdims=True) * inv_hw
        y = d * lax.rsqrt(var + eps)
        return jnp.maximum(y, alpha * y)

    mid = inorm_lrelu(acc)                                   # (R_in, HW)

    # ---- pointwise 1x1 conv: one MXU matmul for all samples in the step -----
    out = jnp.dot(wbig_ref[...].astype(jnp.float32), mid,
                  preferred_element_type=jnp.float32)        # (R_out, HW)

    o_ref[...] = inorm_lrelu(out).astype(o_ref.dtype)


def separable_conv2d_pallas(x, w_dw, w_pw, *, b_tile=None):
    """x: (N, C, H, W); w_dw: (C, 3, 3); w_pw: (Cout, C). stride=1, no bias."""
    N, C, H, W = x.shape
    # The roll+mask depthwise is only valid for 3x3, stride 1, padding 1.
    assert w_dw.shape == (C, 3, 3), "depthwise kernel must be 3x3 (pad=1, stride=1)"
    Cout, Cin = w_pw.shape
    assert Cin == C
    HW = H * W

    # Batch tile: enough samples per grid step to fill the 8-row f32 sublane
    # axis (and amortize per-step pipeline overhead), constrained to divide N.
    if b_tile is None:
        b_tile = math.gcd(N, max(1, 8 // max(C, 1))) if N > 0 else 1
    assert N % b_tile == 0
    # Keep sublane-aligned row blocks; otherwise fall back to one full block.
    if N // b_tile > 1 and ((b_tile * C) % 8 != 0 or (b_tile * Cout) % 8 != 0):
        b_tile = N

    R_in = b_tile * C
    R_out = b_tile * Cout

    # Lane-dense layouts in HBM (plain reshapes, no data movement).
    x2 = x.reshape(N * C, HW)
    wdw_t = jnp.tile(w_dw.reshape(C, 9).astype(jnp.float32), (b_tile, 1))   # (R_in, 9)
    wbig = jnp.kron(jnp.eye(b_tile, dtype=jnp.float32),
                    w_pw.astype(jnp.float32))                               # (R_out, R_in)

    # Precomputed {0,1} border masks, one row per non-center tap.
    pos = jnp.arange(HW, dtype=jnp.int32)
    r = pos // W
    c = pos % W
    mask_rows = []
    for k in _TAPS:
        dy = k // 3 - 1
        dx = k % 3 - 1
        ok = (r + dy >= 0) & (r + dy < H) & (c + dx >= 0) & (c + dx < W)
        mask_rows.append(ok.astype(jnp.float32))
    mask_arr = jnp.stack(mask_rows, axis=0)                                 # (8, HW)

    kernel = functools.partial(_sepconv_kernel, H=H, W=W)

    grid_spec = pltpu.PrefetchScalarGridSpec(
        num_scalar_prefetch=0,
        grid=(N // b_tile,),
        in_specs=[
            pl.BlockSpec((R_in, HW), lambda n: (n, 0)),
            pl.BlockSpec((8, HW), lambda n: (0, 0)),
            pl.BlockSpec((R_in, 9), lambda n: (0, 0)),
            pl.BlockSpec((R_out, R_in), lambda n: (0, 0)),
        ],
        out_specs=pl.BlockSpec((R_out, HW), lambda n: (n, 0)),
        scratch_shapes=[],
    )

    out2 = pl.pallas_call(
        kernel,
        out_shape=jax.ShapeDtypeStruct((N * Cout, HW), x.dtype),
        grid_spec=grid_spec,
        compiler_params=pltpu.CompilerParams(
            dimension_semantics=("parallel",),
            vmem_limit_bytes=32 * 1024 * 1024),
    )(x2, mask_arr, wdw_t, wbig)

    return out2.reshape(N, Cout, H, W)


def _reference(x, w_dw, w_pw):
    """Pure-JAX reference matching the PyTorch SeparableConv2D forward."""
    N, C, H, W = x.shape
    Cout = w_pw.shape[0]
    eps = 1e-5

    def inorm_lrelu(t):
        mu = jnp.mean(t, axis=(2, 3), keepdims=True)
        var = jnp.mean((t - mu) ** 2, axis=(2, 3), keepdims=True)
        y = (t - mu) / jnp.sqrt(var + eps)
        return jnp.where(y >= 0, y, 0.2 * y)

    dw = lax.conv_general_dilated(
        x, w_dw.reshape(C, 1, 3, 3),
        window_strides=(1, 1), padding=((1, 1), (1, 1)),
        dimension_numbers=("NCHW", "OIHW", "NCHW"),
        feature_group_count=C, precision=lax.Precision.HIGHEST)
    h = inorm_lrelu(dw)
    pw = lax.conv_general_dilated(
        h, w_pw.reshape(Cout, C, 1, 1),
        window_strides=(1, 1), padding=((0, 0), (0, 0)),
        dimension_numbers=("NCHW", "OIHW", "NCHW"),
        precision=lax.Precision.HIGHEST)
    return inorm_lrelu(pw)


if __name__ == "__main__":
    # Small shapes consistent with the module: NCHW input, C == Cout.
    N, C, H, W = 2, 4, 16, 16
    Cout = C

    key = jax.random.PRNGKey(0)
    kx, kdw, kpw = jax.random.split(key, 3)
    x = jax.random.normal(kx, (N, C, H, W), jnp.float32)
    # Conv2d weight shapes: depthwise (C,1,3,3) -> (C,3,3); pointwise (Cout,C,1,1) -> (Cout,C).
    w_dw = jax.random.normal(kdw, (C, 3, 3), jnp.float32) * 0.2
    w_pw = jax.random.normal(kpw, (Cout, C), jnp.float32) * 0.2

    fn = jax.jit(separable_conv2d_pallas)
    out = jax.block_until_ready(fn(x, w_dw, w_pw))

    assert out.shape == (N, Cout, H, W), out.shape
    assert bool(jnp.all(jnp.isfinite(out)))

    ref = _reference(x, w_dw, w_pw)
    err = float(jnp.max(jnp.abs(out - ref)))
    assert err < 2e-3, f"max abs error vs reference: {err}"

    print("KERNEL_OK")
</pallas_src>

<mosaic_0001>
module attributes {stable_mosaic.version = 11 : i64} {
  func.func @_sepconv_kernel(%arg0: i32, %arg1: memref<8x256xf32, #tpu.memory_space<vmem>>, %arg2: memref<8x256xf32, #tpu.memory_space<vmem>>, %arg3: memref<8x9xf32, #tpu.memory_space<vmem>>, %arg4: memref<8x8xf32, #tpu.memory_space<vmem>>, %arg5: memref<8x256xf32, #tpu.memory_space<vmem>>) attributes {dimension_semantics = [#tpu.dimension_semantics<parallel>], iteration_bounds = array<i64: 1>, scalar_prefetch = 0 : i64, scratch_operands = 0 : i64, tpu.core_type = #tpu.core_type<tc>, window_params = [{transform_indices = @transform_0, window_bounds = array<i64: 8, 256>}, {pipeline_mode = #tpu.pipeline_mode<synchronous>, transform_indices = @transform_1, window_bounds = array<i64: 8, 256>}, {pipeline_mode = #tpu.pipeline_mode<synchronous>, transform_indices = @transform_2, window_bounds = array<i64: 8, 9>}, {pipeline_mode = #tpu.pipeline_mode<synchronous>, transform_indices = @transform_3, window_bounds = array<i64: 8, 8>}, {transform_indices = @transform_4, window_bounds = array<i64: 8, 256>}]} {
    %c0 = arith.constant 0 : index
    %c0_0 = arith.constant 0 : index
    %0 = vector.load %arg1[%c0, %c0_0] : memref<8x256xf32, #tpu.memory_space<vmem>>, vector<8x256xf32>
    %c0_1 = arith.constant 0 : index
    %c0_2 = arith.constant 0 : index
    %1 = vector.load %arg3[%c0_1, %c0_2] : memref<8x9xf32, #tpu.memory_space<vmem>>, vector<8x9xf32>
    %c0_3 = arith.constant 0 : index
    %c0_4 = arith.constant 0 : index
    %2 = vector.load %arg2[%c0_3, %c0_4] : memref<8x256xf32, #tpu.memory_space<vmem>>, vector<8x256xf32>
    %3 = vector.extract_strided_slice %1 {offsets = [0, 4], sizes = [8, 1], strides = [1, 1]} : vector<8x9xf32> to vector<8x1xf32>
    %4 = vector.broadcast %3 : vector<8x1xf32> to vector<8x256xf32>
    %5 = arith.mulf %4, %0 : vector<8x256xf32>
    %c17_i32 = arith.constant 17 : i32
    %6 = tpu.dynamic_rotate %0 by %c17_i32 dim 1 : vector<8x256xf32>, i32 -> vector<8x256xf32>
    %7 = vector.extract_strided_slice %1 {offsets = [0, 0], sizes = [8, 1], strides = [1, 1]} : vector<8x9xf32> to vector<8x1xf32>
    %8 = vector.extract_strided_slice %2 {offsets = [0, 0], sizes = [1, 256], strides = [1, 1]} : vector<8x256xf32> to vector<1x256xf32>
    %9 = vector.broadcast %8 : vector<1x256xf32> to vector<8x256xf32>
    %10 = arith.mulf %6, %9 : vector<8x256xf32>
    %11 = vector.broadcast %7 : vector<8x1xf32> to vector<8x256xf32>
    %12 = arith.mulf %11, %10 : vector<8x256xf32>
    %13 = arith.addf %5, %12 : vector<8x256xf32>
    %c16_i32 = arith.constant 16 : i32
    %14 = tpu.dynamic_rotate %0 by %c16_i32 dim 1 : vector<8x256xf32>, i32 -> vector<8x256xf32>
    %15 = vector.extract_strided_slice %1 {offsets = [0, 1], sizes = [8, 1], strides = [1, 1]} : vector<8x9xf32> to vector<8x1xf32>
    %16 = vector.extract_strided_slice %2 {offsets = [1, 0], sizes = [1, 256], strides = [1, 1]} : vector<8x256xf32> to vector<1x256xf32>
    %17 = vector.broadcast %16 : vector<1x256xf32> to vector<8x256xf32>
    %18 = arith.mulf %14, %17 : vector<8x256xf32>
    %19 = vector.broadcast %15 : vector<8x1xf32> to vector<8x256xf32>
    %20 = arith.mulf %19, %18 : vector<8x256xf32>
    %21 = arith.addf %13, %20 : vector<8x256xf32>
    %c15_i32 = arith.constant 15 : i32
    %22 = tpu.dynamic_rotate %0 by %c15_i32 dim 1 : vector<8x256xf32>, i32 -> vector<8x256xf32>
    %23 = vector.extract_strided_slice %1 {offsets = [0, 2], sizes = [8, 1], strides = [1, 1]} : vector<8x9xf32> to vector<8x1xf32>
    %24 = vector.extract_strided_slice %2 {offsets = [2, 0], sizes = [1, 256], strides = [1, 1]} : vector<8x256xf32> to vector<1x256xf32>
    %25 = vector.broadcast %24 : vector<1x256xf32> to vector<8x256xf32>
    %26 = arith.mulf %22, %25 : vector<8x256xf32>
    %27 = vector.broadcast %23 : vector<8x1xf32> to vector<8x256xf32>
    %28 = arith.mulf %27, %26 : vector<8x256xf32>
    %29 = arith.addf %21, %28 : vector<8x256xf32>
    %c1_i32 = arith.constant 1 : i32
    %30 = tpu.dynamic_rotate %0 by %c1_i32 dim 1 : vector<8x256xf32>, i32 -> vector<8x256xf32>
    %31 = vector.extract_strided_slice %1 {offsets = [0, 3], sizes = [8, 1], strides = [1, 1]} : vector<8x9xf32> to vector<8x1xf32>
    %32 = vector.extract_strided_slice %2 {offsets = [3, 0], sizes = [1, 256], strides = [1, 1]} : vector<8x256xf32> to vector<1x256xf32>
    %33 = vector.broadcast %32 : vector<1x256xf32> to vector<8x256xf32>
    %34 = arith.mulf %30, %33 : vector<8x256xf32>
    %35 = vector.broadcast %31 : vector<8x1xf32> to vector<8x256xf32>
    %36 = arith.mulf %35, %34 : vector<8x256xf32>
    %37 = arith.addf %29, %36 : vector<8x256xf32>
    %c255_i32 = arith.constant 255 : i32
    %38 = tpu.dynamic_rotate %0 by %c255_i32 dim 1 : vector<8x256xf32>, i32 -> vector<8x256xf32>
    %39 = vector.extract_strided_slice %1 {offsets = [0, 5], sizes = [8, 1], strides = [1, 1]} : vector<8x9xf32> to vector<8x1xf32>
    %40 = vector.extract_strided_slice %2 {offsets = [4, 0], sizes = [1, 256], strides = [1, 1]} : vector<8x256xf32> to vector<1x256xf32>
    %41 = vector.broadcast %40 : vector<1x256xf32> to vector<8x256xf32>
    %42 = arith.mulf %38, %41 : vector<8x256xf32>
    %43 = vector.broadcast %39 : vector<8x1xf32> to vector<8x256xf32>
    %44 = arith.mulf %43, %42 : vector<8x256xf32>
    %45 = arith.addf %37, %44 : vector<8x256xf32>
    %c241_i32 = arith.constant 241 : i32
    %46 = tpu.dynamic_rotate %0 by %c241_i32 dim 1 : vector<8x256xf32>, i32 -> vector<8x256xf32>
    %47 = vector.extract_strided_slice %1 {offsets = [0, 6], sizes = [8, 1], strides = [1, 1]} : vector<8x9xf32> to vector<8x1xf32>
    %48 = vector.extract_strided_slice %2 {offsets = [5, 0], sizes = [1, 256], strides = [1, 1]} : vector<8x256xf32> to vector<1x256xf32>
    %49 = vector.broadcast %48 : vector<1x256xf32> to vector<8x256xf32>
    %50 = arith.mulf %46, %49 : vector<8x256xf32>
    %51 = vector.broadcast %47 : vector<8x1xf32> to vector<8x256xf32>
    %52 = arith.mulf %51, %50 : vector<8x256xf32>
    %53 = arith.addf %45, %52 : vector<8x256xf32>
    %c240_i32 = arith.constant 240 : i32
    %54 = tpu.dynamic_rotate %0 by %c240_i32 dim 1 : vector<8x256xf32>, i32 -> vector<8x256xf32>
    %55 = vector.extract_strided_slice %1 {offsets = [0, 7], sizes = [8, 1], strides = [1, 1]} : vector<8x9xf32> to vector<8x1xf32>
    %56 = vector.extract_strided_slice %2 {offsets = [6, 0], sizes = [1, 256], strides = [1, 1]} : vector<8x256xf32> to vector<1x256xf32>
    %57 = vector.broadcast %56 : vector<1x256xf32> to vector<8x256xf32>
    %58 = arith.mulf %54, %57 : vector<8x256xf32>
    %59 = vector.broadcast %55 : vector<8x1xf32> to vector<8x256xf32>
    %60 = arith.mulf %59, %58 : vector<8x256xf32>
    %61 = arith.addf %53, %60 : vector<8x256xf32>
    %c239_i32 = arith.constant 239 : i32
    %62 = tpu.dynamic_rotate %0 by %c239_i32 dim 1 : vector<8x256xf32>, i32 -> vector<8x256xf32>
    %63 = vector.extract_strided_slice %1 {offsets = [0, 8], sizes = [8, 1], strides = [1, 1]} : vector<8x9xf32> to vector<8x1xf32>
    %64 = vector.extract_strided_slice %2 {offsets = [7, 0], sizes = [1, 256], strides = [1, 1]} : vector<8x256xf32> to vector<1x256xf32>
    %65 = vector.broadcast %64 : vector<1x256xf32> to vector<8x256xf32>
    %66 = arith.mulf %62, %65 : vector<8x256xf32>
    %67 = vector.broadcast %63 : vector<8x1xf32> to vector<8x256xf32>
    %68 = arith.mulf %67, %66 : vector<8x256xf32>
    %69 = arith.addf %61, %68 : vector<8x256xf32>
    %cst = arith.constant dense<0.000000e+00> : vector<8xf32>
    %70 = vector.multi_reduction <add>, %69, %cst [1] : vector<8x256xf32> to vector<8xf32>
    %71 = vector.shape_cast %70 : vector<8xf32> to vector<8x1xf32>
    %cst_5 = arith.constant 3.906250e-03 : f32
    %72 = vector.broadcast %cst_5 : f32 to vector<8x1xf32>
    %73 = arith.mulf %71, %72 : vector<8x1xf32>
    %74 = vector.broadcast %73 : vector<8x1xf32> to vector<8x256xf32>
    %75 = arith.subf %69, %74 : vector<8x256xf32>
    %76 = arith.mulf %75, %75 : vector<8x256xf32>
    %cst_6 = arith.constant dense<0.000000e+00> : vector<8xf32>
    %77 = vector.multi_reduction <add>, %76, %cst_6 [1] : vector<8x256xf32> to vector<8xf32>
    %78 = vector.shape_cast %77 : vector<8xf32> to vector<8x1xf32>
    %cst_7 = arith.constant 3.906250e-03 : f32
    %79 = vector.broadcast %cst_7 : f32 to vector<8x1xf32>
    %80 = arith.mulf %78, %79 : vector<8x1xf32>
    %cst_8 = arith.constant 9.99999974E-6 : f32
    %81 = vector.broadcast %cst_8 : f32 to vector<8x1xf32>
    %82 = arith.addf %80, %81 : vector<8x1xf32>
    %83 = math.rsqrt %82 : vector<8x1xf32>
    %84 = vector.broadcast %83 : vector<8x1xf32> to vector<8x256xf32>
    %85 = arith.mulf %75, %84 : vector<8x256xf32>
    %cst_9 = arith.constant 2.000000e-01 : f32
    %86 = vector.broadcast %cst_9 : f32 to vector<8x256xf32>
    %87 = arith.mulf %86, %85 : vector<8x256xf32>
    %88 = arith.maximumf %85, %87 : vector<8x256xf32>
    %c0_10 = arith.constant 0 : index
    %c0_11 = arith.constant 0 : index
    %89 = vector.load %arg4[%c0_10, %c0_11] : memref<8x8xf32, #tpu.memory_space<vmem>>, vector<8x8xf32>
    %cst_12 = arith.constant dense<0.000000e+00> : vector<8x256xf32>
    %90 = tpu.matmul %89, %88, %cst_12 {dimension_numbers = #tpu.dot_dimension_numbers<[1], [0], [0], [1], [0, 0, 1, 1], [], []>} : vector<8x8xf32>, vector<8x256xf32>, vector<8x256xf32> -> vector<8x256xf32>
    %cst_13 = arith.constant dense<0.000000e+00> : vector<8xf32>
    %91 = vector.multi_reduction <add>, %90, %cst_13 [1] : vector<8x256xf32> to vector<8xf32>
    %92 = vector.shape_cast %91 : vector<8xf32> to vector<8x1xf32>
    %cst_14 = arith.constant 3.906250e-03 : f32
    %93 = vector.broadcast %cst_14 : f32 to vector<8x1xf32>
    %94 = arith.mulf %92, %93 : vector<8x1xf32>
    %95 = vector.broadcast %94 : vector<8x1xf32> to vector<8x256xf32>
    %96 = arith.subf %90, %95 : vector<8x256xf32>
    %97 = arith.mulf %96, %96 : vector<8x256xf32>
    %cst_15 = arith.constant dense<0.000000e+00> : vector<8xf32>
    %98 = vector.multi_reduction <add>, %97, %cst_15 [1] : vector<8x256xf32> to vector<8xf32>
    %99 = vector.shape_cast %98 : vector<8xf32> to vector<8x1xf32>
    %cst_16 = arith.constant 3.906250e-03 : f32
    %100 = vector.broadcast %cst_16 : f32 to vector<8x1xf32>
    %101 = arith.mulf %99, %100 : vector<8x1xf32>
    %cst_17 = arith.constant 9.99999974E-6 : f32
    %102 = vector.broadcast %cst_17 : f32 to vector<8x1xf32>
    %103 = arith.addf %101, %102 : vector<8x1xf32>
    %104 = math.rsqrt %103 : vector<8x1xf32>
    %105 = vector.broadcast %104 : vector<8x1xf32> to vector<8x256xf32>
    %106 = arith.mulf %96, %105 : vector<8x256xf32>
    %cst_18 = arith.constant 2.000000e-01 : f32
    %107 = vector.broadcast %cst_18 : f32 to vector<8x256xf32>
    %108 = arith.mulf %107, %106 : vector<8x256xf32>
    %109 = arith.maximumf %106, %108 : vector<8x256xf32>
    %c0_19 = arith.constant 0 : index
    %c0_20 = arith.constant 0 : index
    %110 = vector.load %arg5[%c0_19, %c0_20] : memref<8x256xf32, #tpu.memory_space<vmem>>, vector<8x256xf32>
    tpu.vector_store %arg5[%c0_19, %c0_20], %109 {strides = array<i32>} : memref<8x256xf32, #tpu.memory_space<vmem>>, vector<8x256xf32>,
    return
  }
  func.func @transform_0(%arg0: i32) -> (i32, i32) {
    %c0_i32 = arith.constant 0 : i32
    %c0_i32_0 = arith.constant 0 : i32
    return %arg0, %c0_i32 : i32, i32
  }
  func.func @transform_1(%arg0: i32) -> (i32, i32) {
    %c0_i32 = arith.constant 0 : i32
    %c0_i32_0 = arith.constant 0 : i32
    %c0_i32_1 = arith.constant 0 : i32
    return %c0_i32, %c0_i32_0 : i32, i32
  }
  func.func @transform_2(%arg0: i32) -> (i32, i32) {
    %c0_i32 = arith.constant 0 : i32
    %c0_i32_0 = arith.constant 0 : i32
    %c0_i32_1 = arith.constant 0 : i32
    return %c0_i32, %c0_i32_0 : i32, i32
  }
  func.func @transform_3(%arg0: i32) -> (i32, i32) {
    %c0_i32 = arith.constant 0 : i32
    %c0_i32_0 = arith.constant 0 : i32
    %c0_i32_1 = arith.constant 0 : i32
    return %c0_i32, %c0_i32_0 : i32, i32
  }
  func.func @transform_4(%arg0: i32) -> (i32, i32) {
    %c0_i32 = arith.constant 0 : i32
    %c0_i32_0 = arith.constant 0 : i32
    return %arg0, %c0_i32 : i32, i32
  }
}

</mosaic_0001>

<bundles_post_ra>
// kernel: separable_conv2d_pallas.1
= control target key start
LH: loop header
LB: loop body
LE: loop exit
PB: predicated region body
PF: predicated region fallthrough
CT: control target
= control target key end

     0   :  { %v385_v0 = vmov 4   ;;  %v386_v3 = vmov 1   ;;  %s387_s19 = smov 17   ;;  %v388_v5 = vmov 0   ;;  %v390_v6 = vmov 2   ;;  %s391_s22 = smov 15   ;;  %s538_s2 = inlined_call_operand.vmem [shape: f32[8,9], index: 2, kind: input, shape index: {}]   ;;  %s539_s0 = inlined_call_operand.vmem [shape: f32[8,256], index: 0, kind: input, shape index: {}]   ;;  %s540_s1 = inlined_call_operand.vmem [shape: f32[8,256], index: 1, kind: input, shape index: {}]   ;;  %s541_s3 = inlined_call_operand.vmem [shape: f32[8,8], index: 3, kind: input, shape index: {}]   ;;  %s542_s4 = inlined_call_operand.vmem [shape: f32[8,256], index: 4, kind: output, shape index: {}]  }
   0x1   :  { %372 = vset.pattern.permute.xlu0 %v385_v0  ;;  %v19_v1 = vld [vmem:[%s538_s2] sm:$0xff]  ;;  %374 = vset.pattern.permute.xlu1 %v386_v3  ;;  %v440_v4 = vld [vmem:[%s539_s0 + $0x8] sm:$0xff]  ;;  %s389_s2 = smov 16   ;;  %v392_v7 = vmov 3   ;;  %v393_v8 = vmov 5   ;;  %v395_v9 = vmov 6   ;;  %v33_v19 = vlaneseq }
   0x2   :  { %v434_v2 = vld [vmem:[%s539_s0] sm:$0xff]  ;;  %24 = vperm.xlu0 %372, %v19_v1   ;;  %s394_s0 = smov 1   ;;  %s396_s23 = smov 127   ;;  %v397_v10 = vmov 7   ;;  %v398_v11 = vmov 8   ;;  %v472_v28 = vld [vmem:[%s540_s1 + $0x8] sm:$0xff] }
   0x3   :  { %29 = vrot.lane.b32.xlu1 %v434_v2, %s387_s19  ;;  %s399_s24 = smov 113   ;;  %s400_s25 = smov 112   ;;  %v459_v22 = vshrl.u32 %v33_v19, 7  ;;  %v461_v25 = vand.u32 127, %v33_v19  ;;  %v467_v27 = vld [vmem:[%s540_s1] sm:$0xff]  ;;  %vm252_vm8 = vcmask 64512  }
   0x4   :  { %s401_s26 = smov 111  }
   0x5   :  { %v40_v26 = vsub.s32 0, %v459_v22  ;;  %v65_v29 = vsub.s32 1, %v459_v22  ;;  %v90_v30 = vsub.s32 2, %v459_v22  ;;  %vm35_vm0 = vcmp.lt.s32.totalorder %v461_v25, 17 }
   0x6   :  { %373 = vset.pattern.permute.xlu0 %v388_v5  ;;  %v115_v33 = vsub.s32 3, %v459_v22  ;;  %vm60_vm1 = vcmp.lt.s32.totalorder %v461_v25, 16  ;;  %v140_v36 = vsub.s32 4, %v459_v22  ;;  %vm85_vm2 = vcmp.lt.s32.totalorder %v461_v25, 15 }
   0x7   :  { %31 = vrot.lane.b32.xlu1 %v440_v4, %s387_s19  ;;  %49 = vperm.xlu0 %373, %v19_v1   ;;  %v41_v34 = vrot.slane %v467_v27, %v40_v26  ;;  %v45_v35 = vrot.slane %v472_v28, %v40_v26  ;;  %v66_v37 = vrot.slane %v467_v27, %v65_v29  ;;  %vm110_vm3 = vcmp.lt.s32.totalorder %v461_v25, 1 }
   0x8   :  { %v70_v38 = vrot.slane %v472_v28, %v65_v29  ;;  %v91_v39 = vrot.slane %v467_v27, %v90_v30  ;;  %v95_v43 = vrot.slane %v472_v28, %v90_v30  ;;  %v116_v47 = vrot.slane %v467_v27, %v115_v33 }
   0x9   :  { %v120_v48 = vrot.slane %v472_v28, %v115_v33  ;;  %vm135_vm4 = vcmp.lt.s32.totalorder %v461_v25, 127  ;;  %v141_v49 = vrot.slane %v467_v27, %v140_v36  ;;  %v165_v50 = vsub.s32 5, %v459_v22 }
   0xa   :  { %v190_v51 = vsub.s32 6, %v459_v22  ;;  %v145_v60 = vrot.slane %v472_v28, %v140_v36  ;;  %vm160_vm5 = vcmp.lt.s32.totalorder %v461_v25, 113  ;;  %vm185_vm6 = vcmp.lt.s32.totalorder %v461_v25, 112 }
   0xb   :  { %74 = vperm.xlu1 %374, %v19_v1   ;;  %56 = vrot.lane.b32.xlu0 %v434_v2, %s389_s2  ;;  %vm210_vm7 = vcmp.lt.s32.totalorder %v461_v25, 111 }
   0xc   :  { %375 = vset.pattern.permute.xlu0 %v390_v6  ;;  %v195_v29 = vrot.slane %v472_v28, %v190_v51 }
   0xf   :  { %58 = vrot.lane.b32.xlu1 %v440_v4, %s389_s2  ;;  %99 = vperm.xlu0 %375, %v19_v1  }
  0x13   :  { %81 = vrot.lane.b32.xlu1 %v434_v2, %s391_s22  ;;  %376 = vset.pattern.permute.xlu0 %v392_v7  ;;  %v166_v7 = vrot.slane %v467_v27, %v165_v50 }
  0x14   :  { %124 = vperm.xlu0 %376, %v19_v1  }
  0x17   :  { %83 = vrot.lane.b32.xlu1 %v440_v4, %s391_s22 }
  0x18   :  { %377 = vset.pattern.permute.xlu0 %v393_v8  ;;  %v170_v8 = vrot.slane %v472_v28, %v165_v50 }
  0x19   :  { %149 = vperm.xlu0 %377, %v19_v1  }
  0x1b   :  { %106 = vrot.lane.b32.xlu1 %v434_v2, %s394_s0 }
  0x1d   :  { %378 = vset.pattern.permute.xlu0 %v395_v9 }
  0x1e   :  { %174 = vperm.xlu0 %378, %v19_v1  }
  0x1f   :  { %108 = vrot.lane.b32.xlu1 %v440_v4, %s394_s0 }
  0x22   :  { %379 = vset.pattern.permute.xlu0 %v397_v10 }
  0x23   :  { %131 = vrot.lane.b32.xlu1 %v434_v2, %s396_s23  ;;  %199 = vperm.xlu0 %379, %v19_v1  }
  0x27   :  { %133 = vrot.lane.b32.xlu1 %v440_v4, %s396_s23  ;;  %380 = vset.pattern.permute.xlu0 %v398_v11 }
  0x28   :  { %224 = vperm.xlu0 %380, %v19_v1  }
  0x2b   :  { %156 = vrot.lane.b32.xlu1 %v434_v2, %s399_s24 }
  0x2f   :  { %158 = vrot.lane.b32.xlu1 %v440_v4, %s399_s24 }
  0x33   :  { %181 = vrot.lane.b32.xlu1 %v434_v2, %s400_s25 }
  0x37   :  { %183 = vrot.lane.b32.xlu1 %v440_v4, %s400_s25 }
  0x3b   :  { %206 = vrot.lane.b32.xlu1 %v434_v2, %s401_s26 }
  0x3f   :  { %208 = vrot.lane.b32.xlu1 %v440_v4, %s401_s26 }
  0x75   :  { %v30_v12 = vpop.permute.xlu1 %29 }
  0x79   :  { %v32_v13 = vpop.permute.xlu1 %31 }
  0x7a   :  { %v36_v41 = vsel %vm35_vm0, %v30_v12, %v32_v13  ;;  %v37_v42 = vsel %vm35_vm0, %v32_v13, %v30_v12 }
  0x7b   :  { %v46_v52 = vmul.f32 %v41_v34, %v37_v42  ;;  %v47_v53 = vmul.f32 %v45_v35, %v36_v41 }
  0x7d   :  { %v25_v20 = vpop.permute.xlu0 %24 }
  0x7e   :  { %v27_v61 = vmul.f32 %v25_v20, %v434_v2  ;;  %v28_v62 = vmul.f32 %v25_v20, %v440_v4  ;;  %v191_v2 = vrot.slane %v467_v27, %v190_v51 }
  0x82   :  { %v50_v24 = vpop.permute.xlu0 %49 }
  0x83   :  { %v52_v63 = vmul.f32 %v50_v24, %v46_v52  ;;  %v53_v0 = vmul.f32 %v50_v24, %v47_v53 }
  0x86   :  { %v457_v14 = vpop.permute.xlu1 %74  ;;  %v57_v32 = vpop.permute.xlu0 %56 }
  0x8a   :  { %v59_v15 = vpop.permute.xlu1 %58  ;;  %v100_v44 = vpop.permute.xlu0 %99 }
  0x8b   :  { %v61_v45 = vsel %vm60_vm1, %v57_v32, %v59_v15  ;;  %v62_v46 = vsel %vm60_vm1, %v59_v15, %v57_v32  ;;  %v54_v15 = vadd.f32 %v52_v63, %v27_v61 }
  0x8c   :  { %v71_v57 = vmul.f32 %v66_v37, %v62_v46  ;;  %v72_v58 = vmul.f32 %v70_v38, %v61_v45 }
  0x8e   :  { %v82_v16 = vpop.permute.xlu1 %81  ;;  %v77_v4 = vmul.f32 %v457_v14, %v71_v57  ;;  %v78_v10 = vmul.f32 %v457_v14, %v72_v58 }
  0x8f   :  { %v125_v59 = vpop.permute.xlu0 %124 }
  0x92   :  { %v84_v17 = vpop.permute.xlu1 %83 }
  0x93   :  { %v86_v54 = vsel %vm85_vm2, %v82_v16, %v84_v17  ;;  %v87_v55 = vsel %vm85_vm2, %v84_v17, %v82_v16  ;;  %v55_v16 = vadd.f32 %v53_v0, %v28_v62 }
  0x94   :  { %v96_v1 = vmul.f32 %v91_v39, %v87_v55  ;;  %v97_v3 = vmul.f32 %v95_v43, %v86_v54  ;;  %v150_v13 = vpop.permute.xlu0 %149 }
  0x95   :  { %v80_v32 = vadd.f32 %v78_v10, %v55_v16 }
  0x96   :  { %v107_v18 = vpop.permute.xlu1 %106  ;;  %v102_v19 = vmul.f32 %v100_v44, %v96_v1  ;;  %v103_v20 = vmul.f32 %v100_v44, %v97_v3 }
  0x98   :  { %v105_v41 = vadd.f32 %v103_v20, %v80_v32 }
  0x99   :  { %v175_v33 = vpop.permute.xlu0 %174 }
  0x9a   :  { %v109_v21 = vpop.permute.xlu1 %108 }
  0x9b   :  { %v111_v5 = vsel %vm110_vm3, %v107_v18, %v109_v21  ;;  %v112_v6 = vsel %vm110_vm3, %v109_v21, %v107_v18 }
  0x9c   :  { %v121_v17 = vmul.f32 %v116_v47, %v112_v6  ;;  %v122_v18 = vmul.f32 %v120_v48, %v111_v5 }
  0x9e   :  { %v132_v23 = vpop.permute.xlu1 %131  ;;  %v127_v36 = vmul.f32 %v125_v59, %v121_v17  ;;  %v128_v37 = vmul.f32 %v125_v59, %v122_v18  ;;  %v200_v46 = vpop.permute.xlu0 %199 }
  0xa0   :  { %v130_v50 = vadd.f32 %v128_v37, %v105_v41 }
  0xa2   :  { %v134_v31 = vpop.permute.xlu1 %133 }
  0xa3   :  { %v136_v11 = vsel %vm135_vm4, %v132_v23, %v134_v31  ;;  %v137_v12 = vsel %vm135_vm4, %v134_v31, %v132_v23  ;;  %v215_v23 = vsub.s32 7, %v459_v22  ;;  %v79_v31 = vadd.f32 %v77_v4, %v54_v15 }
  0xa4   :  { %v146_v14 = vmul.f32 %v141_v49, %v136_v11  ;;  %v147_v26 = vmul.f32 %v145_v60, %v137_v12  ;;  %v225_v60 = vpop.permute.xlu0 %224  ;;  %v402_v12 = vmov 0.0  }
  0xa5   :  { %v216_v47 = vrot.slane %v467_v27, %v215_v23  ;;  %v220_v48 = vrot.slane %v472_v28, %v215_v23  ;;  %320 = vmatprep.mubr.f32.mxu0 %v402_v12 }
  0xa6   :  { %v157_v40 = vpop.permute.xlu1 %156  ;;  %v152_v42 = vmul.f32 %v150_v13, %v146_v14  ;;  %v153_v43 = vmul.f32 %v150_v13, %v147_v26  ;;  %v251_v26 = vld [vmem:[%s541_s3] sm:$0xff] }
  0xa8   :  { %v155_v54 = vadd.f32 %v153_v43, %v130_v50 }
  0xaa   :  { %v159_v56 = vpop.permute.xlu1 %158 }
  0xab   :  { %v161_v21 = vsel %vm160_vm5, %v157_v40, %v159_v56  ;;  %v162_v24 = vsel %vm160_vm5, %v159_v56, %v157_v40  ;;  %v104_v40 = vadd.f32 %v102_v19, %v79_v31 }
  0xac   :  { %v171_v38 = vmul.f32 %v166_v7, %v161_v21  ;;  %v172_v39 = vmul.f32 %v170_v8, %v162_v24 }
  0xad   :  { %v129_v49 = vadd.f32 %v127_v36, %v104_v40 }
  0xae   :  { %v182_v9 = vpop.permute.xlu1 %181  ;;  %v177_v51 = vmul.f32 %v175_v33, %v171_v38  ;;  %v178_v52 = vmul.f32 %v175_v33, %v172_v39 }
  0xaf   :  { %v154_v53 = vadd.f32 %v152_v42, %v129_v49 }
  0xb0   :  { %v180_v62 = vadd.f32 %v178_v52, %v155_v54 }
  0xb1   :  { %v179_v61 = vadd.f32 %v177_v51, %v154_v53 }
  0xb2   :  { %v184_v30 = vpop.permute.xlu1 %183 }
  0xb3   :  { %v186_v34 = vsel %vm185_vm6, %v182_v9, %v184_v30  ;;  %v187_v35 = vsel %vm185_vm6, %v184_v30, %v182_v9 }
  0xb4   :  { %v196_v44 = vmul.f32 %v191_v2, %v186_v34  ;;  %v197_v45 = vmul.f32 %v195_v29, %v187_v35 }
  0xb6   :  { %v207_v22 = vpop.permute.xlu1 %206  ;;  %v202_v55 = vmul.f32 %v200_v46, %v196_v44  ;;  %v203_v56 = vmul.f32 %v200_v46, %v197_v45 }
  0xb8   :  { %v204_v0 = vadd.f32 %v202_v55, %v179_v61  ;;  %v205_v27 = vadd.f32 %v203_v56, %v180_v62 }
  0xba   :  { %v209_v57 = vpop.permute.xlu1 %208 }
  0xbb   :  { %v211_v58 = vsel %vm210_vm7, %v207_v22, %v209_v57  ;;  %v212_v59 = vsel %vm210_vm7, %v209_v57, %v207_v22 }
  0xbc   :  { %v221_v63 = vmul.f32 %v216_v47, %v211_v58  ;;  %v222_v25 = vmul.f32 %v220_v48, %v212_v59 }
  0xbe   :  { %v227_v1 = vmul.f32 %v225_v60, %v221_v63  ;;  %v228_v28 = vmul.f32 %v225_v60, %v222_v25 }
  0xc0   :  { %v229_v3 = vadd.f32 %v227_v1, %v204_v0  ;;  %v230_v5 = vadd.f32 %v228_v28, %v205_v27 }
  0xc2   :  { %v231_v6 = vadd.f32 %v230_v5, %v229_v3 }
  0xc4   :  { %232 = vadd.xlane.f32.xlu0 %v231_v6 }
 0x14d   :  { %v233_v7 = vpop.xlane.xlu0 %232 }
 0x14e   :  { %v234_v8 = vmul.f32 0.00390625, %v233_v7 }
 0x150   :  { %v235_v9 = vsub.f32 %v229_v3, %v234_v8  ;;  %v236_v2 = vsub.f32 %v230_v5, %v234_v8 }
 0x152   :  { %v237_v4 = vmul.f32 %v235_v9, %v235_v9  ;;  %v238_v10 = vmul.f32 %v236_v2, %v236_v2 }
 0x154   :  { %v239_v11 = vadd.f32 %v238_v10, %v237_v4 }
 0x156   :  { %240 = vadd.xlane.f32.xlu1 %v239_v11 }
 0x1df   :  { %v241_v13 = vpop.xlane.xlu1 %240 }
 0x1e0   :  { %v242_v15 = vmul.f32 0.00390625, %v241_v13 }
 0x1e2   :  { %v243_v16 = vadd.f32 1e-05, %v242_v15 }
 0x1e4   :  { %381 = vrsqrt.f32 %v243_v16 }
 0x1f1   :  { %v382_v17 = vpop.eup %381 }
 0x1f2   :  { %v246_v18 = vmul.f32 %v382_v17, %v236_v2  ;;  %v245_v19 = vmul.f32 %v382_v17, %v235_v9 }
 0x1f4   :  { %v248_v20 = vmul.f32 0.2, %v246_v18  ;;  %v247_v21 = vmul.f32 0.2, %v245_v19 }
 0x1f6   :  { %v250_v24 = vmax.f32 %v246_v18, %v248_v20  ;;  %v249_v14 = vmax.f32 %v245_v19, %v247_v21 }
 0x1f8   :  { %286 = vmatprep.subr.mxu0 %v250_v24 }
 0x1f9   :  { %287 = vmatpush1.msra.mxu0 %v249_v14 }
 0x1fa   :  { %353 = vmatmul.mubr.msk.f32.vlgmr.msra.gmra.mxu0 %vm252_vm8, %v251_v26 }
 0x2ba   :  { %v322_v29 = vpop.f32.mrf.mxu0 }
 0x2bc   :  { %v324_v30 = vpop.f32.mrf.mxu0 }
 0x2bd   :  { %v327_v23 = vadd.f32 %v324_v30, %v322_v29 }
 0x2bf   :  { %328 = vadd.xlane.f32.xlu0 %v327_v23 }
 0x348   :  { %v329_v31 = vpop.xlane.xlu0 %328 }
 0x349   :  { %v330_v32 = vmul.f32 0.00390625, %v329_v31 }
 0x34b   :  { %v331_v33 = vsub.f32 %v322_v29, %v330_v32  ;;  %v332_v34 = vsub.f32 %v324_v30, %v330_v32 }
 0x34d   :  { %v333_v35 = vmul.f32 %v331_v33, %v331_v33  ;;  %v334_v36 = vmul.f32 %v332_v34, %v332_v34 }
 0x34f   :  { %v335_v37 = vadd.f32 %v334_v36, %v333_v35 }
 0x351   :  { %336 = vadd.xlane.f32.xlu0 %v335_v37 }
 0x3da   :  { %v337_v38 = vpop.xlane.xlu0 %336 }
 0x3db   :  { %v338_v39 = vmul.f32 0.00390625, %v337_v38 }
 0x3dd   :  { %v339_v40 = vadd.f32 1e-05, %v338_v39 }
 0x3df   :  { %383 = vrsqrt.f32 %v339_v40 }
 0x3ec   :  { %v384_v41 = vpop.eup %383 }
 0x3ed   :  { %v341_v42 = vmul.f32 %v384_v41, %v331_v33  ;;  %v342_v43 = vmul.f32 %v384_v41, %v332_v34 }
 0x3ef   :  { %v343_v44 = vmul.f32 0.2, %v341_v42  ;;  %v344_v45 = vmul.f32 0.2, %v342_v43 }
 0x3f1   :  { %v345_v22 = vmax.f32 %v341_v42, %v343_v44  ;;  %v346_v46 = vmax.f32 %v342_v43, %v344_v45 }
 0x3f3   :  { %347 = vst [vmem:[%s542_s4] sm:$0xff] %v345_v22  ;;  %348 = vst [vmem:[%s542_s4 + $0x8] sm:$0xff] %v346_v46 }

</bundles_post_ra>
